<compile_context>
chip_gen: v7x
topology: tpu7x:2x2x1
jax: 0.10.0
libtpu: 0.0.40
codegen_flags: <defaults>
</compile_context>

<pallas_src>
import functools
import numpy as np
import jax
import jax.numpy as jnp
from jax import lax
from jax.experimental import pallas as pl
from jax.experimental.pallas import tpu as pltpu


_VMEM_LIMIT = 32 * 1024 * 1024


def _round_up(x, m):
    return ((x + m - 1) // m) * m


# ----------------------------- Pallas kernels ------------------------------

def _gated_conv_kernel(x_ref, w_ref, b_ref, o_ref, *, npad):
    """Fused gated-conv tile: one bf16 matmul against the packed [K, 2*N]
    (conv || gate) weight, f32 accumulate, bias, LeakyReLU(0.01),
    sigmoid (exp + approx reciprocal on the EUP), product."""
    acc = jnp.dot(x_ref[...], w_ref[...], preferred_element_type=jnp.float32)
    acc = acc + b_ref[...]
    conv = acc[:, :npad]
    gate = acc[:, npad:]
    act = jnp.where(conv >= 0.0, conv, 0.01 * conv)           # nn.LeakyReLU()
    sig = pl.reciprocal(1.0 + jnp.exp(-gate), approx=True)    # nn.Sigmoid()
    o_ref[...] = act * sig


def _plain_conv_kernel(x_ref, w_ref, b_ref, o_ref):
    """Conv-as-matmul + bias (GatedConv2d with activation=False)."""
    o_ref[...] = jnp.dot(x_ref[...], w_ref[...],
                         preferred_element_type=jnp.float32) + b_ref[...]


def _ca_score_kernel(fp_ref, bsi_ref, o_ref):
    """Contextual-attention score for one batch element:
    L2-normalise bg patches (rsqrt, clamp) and 'NT' matmul against fg patches."""
    fp = fp_ref[0]                                   # [P, K]
    bsi = bsi_ref[0]                                 # [L, K]
    sq = jnp.sum(bsi * bsi, axis=-1, keepdims=True)
    inv = lax.rsqrt(jnp.maximum(sq, 1e-8))           # == 1 / max(||.||, 1e-4)
    bsin = bsi * inv
    score = lax.dot_general(fp, bsin, (((1,), (1,)), ((), ())),
                            preferred_element_type=jnp.float32)   # [P, L]
    o_ref[0] = score


def _ca_attend_kernel(s_ref, m_ref, bi_ref, o_ref, *, scale):
    """Fused masked softmax (matches torch order: *mask, softmax, *mask) +
    transposed-conv matmul for one batch element."""
    s = s_ref[0]                                     # [P, L]
    m = m_ref[0]                                     # [1, L]
    x = s * m * scale
    x = x - jnp.max(x, axis=-1, keepdims=True)
    e = jnp.exp(x)
    p = e * pl.reciprocal(jnp.sum(e, axis=-1, keepdims=True), approx=True)
    p = p * m
    o_ref[0] = jnp.dot(p, bi_ref[0], preferred_element_type=jnp.float32)


# --------------------------- pallas_call wrappers ---------------------------

def _conv_matmul(cols, w, b, gated, npad):
    """cols: [M, Kpad] bf16; w: [Kpad, Wn] bf16; b: [1, Wn] f32.
    Tiled over M ('parallel' -> megacore on v7x); weights/bias stay resident."""
    M, kpad = cols.shape
    wn = w.shape[1]
    nout = npad if gated else wn
    tm = 256 if M >= 256 else max(16, _round_up(M, 16))
    mpad = _round_up(M, tm)
    if mpad != M:
        cols = jnp.pad(cols, ((0, mpad - M), (0, 0)))
    kernel = (functools.partial(_gated_conv_kernel, npad=npad) if gated
              else _plain_conv_kernel)
    return pl.pallas_call(
        kernel,
        out_shape=jax.ShapeDtypeStruct((mpad, nout), jnp.float32),
        grid=(mpad // tm,),
        in_specs=[
            pl.BlockSpec((tm, kpad), lambda i: (i, 0)),
            pl.BlockSpec((kpad, wn), lambda i: (0, 0)),
            pl.BlockSpec((1, wn), lambda i: (0, 0)),
        ],
        out_specs=pl.BlockSpec((tm, nout), lambda i: (i, 0)),
        compiler_params=pltpu.CompilerParams(
            dimension_semantics=("parallel",),
            vmem_limit_bytes=_VMEM_LIMIT),
    )(cols, w, b)


def ca_score(fp, bsi):
    B, L, K = fp.shape
    return pl.pallas_call(
        _ca_score_kernel,
        out_shape=jax.ShapeDtypeStruct((B, L, L), jnp.float32),
        grid=(B,),
        in_specs=[pl.BlockSpec((1, L, K), lambda b: (b, 0, 0)),
                  pl.BlockSpec((1, L, K), lambda b: (b, 0, 0))],
        out_specs=pl.BlockSpec((1, L, L), lambda b: (b, 0, 0)),
        compiler_params=pltpu.CompilerParams(
            dimension_semantics=("parallel",),
            vmem_limit_bytes=_VMEM_LIMIT),
    )(fp, bsi)


def ca_attend(score, mi, bi, scale):
    B, P, L = score.shape
    K = bi.shape[2]
    return pl.pallas_call(
        functools.partial(_ca_attend_kernel, scale=scale),
        out_shape=jax.ShapeDtypeStruct((B, P, K), jnp.float32),
        grid=(B,),
        in_specs=[pl.BlockSpec((1, P, L), lambda b: (b, 0, 0)),
                  pl.BlockSpec((1, 1, L), lambda b: (b, 0, 0)),
                  pl.BlockSpec((1, L, K), lambda b: (b, 0, 0))],
        out_specs=pl.BlockSpec((1, P, K), lambda b: (b, 0, 0)),
        compiler_params=pltpu.CompilerParams(
            dimension_semantics=("parallel",),
            vmem_limit_bytes=_VMEM_LIMIT),
    )(score, mi, bi)


# ------------------------------ JAX-side glue -------------------------------

def im2col(x, ks, stride, dilation):
    """x: [B, Hp, Wp, C] (already padded) -> ([B*oh*ow, ks*ks*C], oh, ow).
    Column ordering is (ki, kj, C)."""
    B, Hp, Wp, C = x.shape
    span = dilation * (ks - 1) + 1
    oh = (Hp - span) // stride + 1
    ow = (Wp - span) // stride + 1
    cols = []
    for ki in range(ks):
        for kj in range(ks):
            i0 = ki * dilation
            j0 = kj * dilation
            cols.append(x[:, i0:i0 + (oh - 1) * stride + 1:stride,
                             j0:j0 + (ow - 1) * stride + 1:stride, :])
    cols = jnp.stack(cols, axis=3)                      # [B, oh, ow, ks*ks, C]
    return cols.reshape(B * oh * ow, ks * ks * C), oh, ow


def gated_conv2d(x, p, stride=1, padding=0, dilation=1, activation=True):
    """GatedConv2d.forward: replicate-pad, conv(pad=0), gate, product. x: NHWC."""
    B = x.shape[0]
    ks = p['ks']
    xp = jnp.pad(x, ((0, 0), (padding, padding), (padding, padding), (0, 0)),
                 mode='edge')
    cols, oh, ow = im2col(xp, ks, stride, dilation)
    # TODO(synk): fold the ks*ks window loop into the kernel as a K-reduction
    # grid axis to avoid staging the duplicated im2col matrix through HBM.
    M, K = cols.shape
    cols = cols.astype(jnp.bfloat16)
    if p['kpad'] != K:
        cols = jnp.pad(cols, ((0, 0), (0, p['kpad'] - K)))
    if activation:
        y = _conv_matmul(cols, p['w2'], p['b2'], True, p['npad'])
    else:
        y = _conv_matmul(cols, p['w1'], p['b1'], False, p['npad'])
    y = y[:M, :p['cout']]
    return y.reshape(B, oh, ow, p['cout'])


def upsample2(x):
    """F.interpolate(scale_factor=2, mode='nearest') on NHWC."""
    return jnp.repeat(jnp.repeat(x, 2, axis=1), 2, axis=2)


def contextual_attention(f_o, b_o, mask_o, ps=3, r=2, fs=3, ss=10.0):
    """ContextualAttention.forward (patch_size=3, rate=2, fuse=True). NHWC."""
    pad = (ps - 1) // 2
    B, H, W, c = f_o.shape

    # background patches at full resolution (kernels of the transposed conv)
    b_o_pad = jnp.pad(b_o, ((0, 0), (pad, pad), (pad, pad), (0, 0)), mode='edge')
    bi_cols, _, _ = im2col(b_o_pad, ps, r, 1)                    # [B*L, ps*ps*c]

    # nearest downsample by rate
    f = f_o[:, ::r, ::r, :]
    b = b_o[:, ::r, ::r, :]
    m = mask_o[:, ::r, ::r, :]
    hr, wr = f.shape[1], f.shape[2]
    L = hr * wr
    K = ps * ps * c

    b_pad = jnp.pad(b, ((0, 0), (pad, pad), (pad, pad), (0, 0)), mode='edge')
    bsi_cols, _, _ = im2col(b_pad, ps, 1, 1)                     # [B*L, K]

    m_pad = jnp.pad(m, ((0, 0), (pad, pad), (pad, pad), (0, 0)))  # F.unfold zero-pads
    m_cols, _, _ = im2col(m_pad, ps, 1, 1)                       # [B*L, ps*ps]
    m_mean = jnp.mean(m_cols.reshape(B, L, ps * ps), axis=2)
    mi = (m_mean == 0.0).astype(jnp.float32).reshape(B, 1, L)    # [B, 1, L]

    f_padz = jnp.pad(f, ((0, 0), (pad, pad), (pad, pad), (0, 0)))  # F.conv2d zero-pads
    f_cols, _, _ = im2col(f_padz, ps, 1, 1)                      # [B*L, K]

    fp = f_cols.reshape(B, L, K)
    bsi = bsi_cols.reshape(B, L, K)
    bi = bi_cols.reshape(B, L, K)

    score = ca_score(fp, bsi)                                    # Pallas: [B, P, L]

    # "fuse": two passes of a 3x3 identity-kernel conv over the (l, p) score
    # matrix with an hr/wr transpose in between (batched tiny shifted adds).
    s_lp = jnp.transpose(score, (0, 2, 1))                       # [B, l, p]

    def diag3(Mm):
        Mp = jnp.pad(Mm, ((0, 0), (1, 1), (1, 1)))
        return (Mp[:, 0:L, 0:L] + Mp[:, 1:L + 1, 1:L + 1]
                + Mp[:, 2:L + 2, 2:L + 2])

    F1 = diag3(s_lp)
    F1t = F1.reshape(B, hr, wr, hr, wr).transpose(0, 2, 1, 4, 3).reshape(B, L, L)
    F2 = diag3(F1t)
    s_lp = F2.reshape(B, wr, hr, wr, hr).transpose(0, 2, 1, 4, 3).reshape(B, L, L)
    score = jnp.transpose(s_lp, (0, 2, 1))                       # back to [B, p, l]

    cols = ca_attend(score, mi, bi, ss)                          # Pallas: [B, P, K]

    # col2im scatter-add (conv_transpose2d stride=r, padding=pad), /4,
    # replicate-pad bottom/right when the deconv output is odd-sized.
    cols6 = cols.reshape(B, hr, wr, ps, ps, c)
    out_sz = (hr - 1) * r - 2 * pad + ps
    bufH = (hr - 1) * r + ps
    bufW = (wr - 1) * r + ps
    buf = jnp.zeros((B, bufH, bufW, c), jnp.float32)
    for ki in range(ps):
        for kj in range(ps):
            buf = buf.at[:, ki:ki + (hr - 1) * r + 1:r,
                            kj:kj + (wr - 1) * r + 1:r, :].add(cols6[:, :, :, ki, kj, :])
    res = buf[:, pad:pad + out_sz, pad:pad + out_sz, :] / 4.0
    if out_sz % 2 == 1:
        res = jnp.pad(res, ((0, 0), (0, 1), (0, 1), (0, 0)), mode='edge')
    return res                                                   # [B, H, W, c]


# ------------------------------ parameters ----------------------------------

def init_gated_params(key, cin, cout, ks):
    k = jax.random.split(key, 4)
    K = ks * ks * cin
    std = 1.0 / np.sqrt(K)
    wc = std * jax.random.normal(k[0], (K, cout), jnp.float32)
    bc = std * jax.random.normal(k[1], (1, cout), jnp.float32)
    wg = std * jax.random.normal(k[2], (K, cout), jnp.float32)
    bg = std * jax.random.normal(k[3], (1, cout), jnp.float32)

    kpad = _round_up(K, 128)
    npad = _round_up(cout, 128)

    def pad_w(w):
        return jnp.pad(w, ((0, kpad - K), (0, npad - cout)))

    def pad_b(bb):
        return jnp.pad(bb, ((0, 0), (0, npad - cout)))

    wc_p, wg_p = pad_w(wc), pad_w(wg)
    bc_p, bg_p = pad_b(bc), pad_b(bg)
    return dict(
        ks=ks, cout=cout, kpad=kpad, npad=npad,
        # packed (conv || gate) weight for the fused gated kernel
        w2=jnp.concatenate([wc_p, wg_p], axis=1).astype(jnp.bfloat16),
        b2=jnp.concatenate([bc_p, bg_p], axis=1),
        # conv-only weight for activation=False layers
        w1=wc_p.astype(jnp.bfloat16),
        b1=bc_p,
    )


def init_painter_params(key, in_ch):
    cfg = {
        'conv1': (in_ch + 2, 32, 5), 'conv2': (32, 64, 3), 'conv3': (64, 64, 3),
        'conv4': (64, 128, 3), 'conv5': (128, 128, 3), 'conv6': (128, 128, 3),
        'conv7': (128, 128, 3), 'conv8': (128, 128, 3), 'conv9': (128, 128, 3),
        'conv10': (128, 128, 3), 'conv11': (128, 128, 3), 'conv12': (128, 128, 3),
        'conv13': (128, 64, 3), 'conv14': (64, 64, 3), 'conv15': (64, 32, 3),
        'conv16': (32, 16, 3), 'conv17': (16, in_ch, 3),
        'xconv1': (in_ch + 2, 32, 5), 'xconv2': (32, 32, 3), 'xconv3': (32, 64, 3),
        'xconv4': (64, 64, 3), 'xconv5': (64, 128, 3), 'xconv6': (128, 128, 3),
        'xconv7': (128, 128, 3), 'xconv8': (128, 128, 3), 'xconv9': (128, 128, 3),
        'xconv10': (128, 128, 3),
        'pmconv1': (in_ch + 2, 32, 5), 'pmconv2': (32, 32, 3), 'pmconv3': (32, 64, 3),
        'pmconv4': (64, 128, 3), 'pmconv5': (128, 128, 3), 'pmconv6': (128, 128, 3),
        'pmconv7': (128, 128, 3), 'pmconv8': (128, 128, 3),
        'fconv1': (256, 128, 3), 'fconv2': (128, 128, 3), 'fconv3': (128, 64, 3),
        'fconv4': (64, 64, 3), 'fconv5': (64, 32, 3), 'fconv6': (32, 16, 3),
        'fconv7': (16, in_ch, 3),
    }
    params = {}
    for i, name in enumerate(sorted(cfg)):
        cin, cout, ks = cfg[name]
        params[name] = init_gated_params(jax.random.fold_in(key, i), cin, cout, ks)
    return params


# ------------------------------- forward pass --------------------------------

def painter_forward(params, x_nchw, mask_nchw):
    """PainterNet.forward (pretrain=False). Inputs/outputs NCHW, compute NHWC."""
    to_nhwc = lambda t: jnp.transpose(t, (0, 2, 3, 1))
    to_nchw = lambda t: jnp.transpose(t, (0, 3, 1, 2))

    x = to_nhwc(x_nchw)
    mask = to_nhwc(mask_nchw)
    xin = x
    ones_b = jnp.ones_like(mask)
    xcat = jnp.concatenate([x, ones_b, mask], axis=-1)
    mask_s = mask[:, ::4, ::4, :]      # F.interpolate(scale_factor=0.25, 'nearest')

    gc = lambda name, t, **kw: gated_conv2d(t, params[name], **kw)

    # ---- coarse branch ----
    h = gc('conv1', xcat, padding=2)
    h = gc('conv2', h, stride=2, padding=1)
    h = gc('conv3', h, padding=1)
    h = gc('conv4', h, stride=2, padding=1)
    h = gc('conv5', h, padding=1)
    h = gc('conv6', h, padding=1)
    h = gc('conv7', h, padding=2, dilation=2)
    h = gc('conv8', h, padding=4, dilation=4)
    h = gc('conv9', h, padding=8, dilation=8)
    h = gc('conv10', h, padding=16, dilation=16)
    h = gc('conv11', h, padding=1)
    h = gc('conv12', h, padding=1)
    h = upsample2(h)
    h = gc('conv13', h, padding=1)
    h = gc('conv14', h, padding=1)
    h = upsample2(h)
    h = gc('conv15', h, padding=1)
    h = gc('conv16', h, padding=1)
    h = gc('conv17', h, padding=1, activation=False)
    h = jnp.clip(h, -1.0, 1.0)
    x_coarse = h * mask + xin * (mask == 0.0).astype(jnp.float32)

    # ---- refinement: conv branch ----
    x_cur = jnp.concatenate([x_coarse, ones_b, mask], axis=-1)
    h = gc('xconv1', x_cur, padding=2)
    h = gc('xconv2', h, stride=2, padding=1)
    h = gc('xconv3', h, padding=1)
    h = gc('xconv4', h, stride=2, padding=1)
    h = gc('xconv5', h, padding=1)
    h = gc('xconv6', h, padding=1)
    h = gc('xconv7', h, padding=2, dilation=2)
    h = gc('xconv8', h, padding=4, dilation=4)
    h = gc('xconv9', h, padding=8, dilation=8)
    h = gc('xconv10', h, padding=16, dilation=16)
    x_conv = h

    # ---- refinement: attention branch ----
    h = gc('pmconv1', x_cur, padding=2)
    h = gc('pmconv2', h, stride=2, padding=1)
    h = gc('pmconv3', h, padding=1)
    h = gc('pmconv4', h, stride=2, padding=1)
    h = gc('pmconv5', h, padding=1)
    h = gc('pmconv6', h, padding=1)
    f = h
    b = h
    h = contextual_attention(f, b, mask_s, ps=3, r=2, fs=3, ss=10.0)
    h = gc('pmconv7', h, padding=1)
    h = gc('pmconv8', h, padding=1)
    x_att = h

    # ---- merge + decoder ----
    h = jnp.concatenate([x_conv, x_att], axis=-1)
    h = gc('fconv1', h, padding=1)
    h = gc('fconv2', h, padding=1)
    h = upsample2(h)
    h = gc('fconv3', h, padding=1)
    h = gc('fconv4', h, padding=1)
    h = upsample2(h)
    h = gc('fconv5', h, padding=1)
    h = gc('fconv6', h, padding=1)
    h = gc('fconv7', h, padding=1, activation=False)
    h = jnp.clip(h, -1.0, 1.0)

    return to_nchw(x_coarse), to_nchw(h)


# ---------------------------------- main -------------------------------------

if __name__ == "__main__":
    in_channels = 4
    B, H, W = 2, 16, 16

    key = jax.random.PRNGKey(0)
    kx, km = jax.random.split(key)
    x = jax.random.uniform(kx, (B, in_channels, H, W), jnp.float32, -1.0, 1.0)
    mask = (jax.random.uniform(km, (B, 1, H, W)) > 0.5).astype(jnp.float32)

    params = init_painter_params(jax.random.PRNGKey(42), in_channels)

    x_coarse, x_fine = painter_forward(params, x, mask)
    (x_coarse, x_fine) = jax.block_until_ready((x_coarse, x_fine))

    assert x_coarse.shape == (B, in_channels, H, W)
    assert x_fine.shape == (B, in_channels, H, W)
    assert jnp.all(jnp.isfinite(x_coarse)) and jnp.all(jnp.isfinite(x_fine))
    print("KERNEL_OK")
</pallas_src>

<mosaic_0001>
module attributes {stable_mosaic.version = 11 : i64} {
  func.func @_gated_conv_kernel(%arg0: i32, %arg1: memref<256x256xbf16, #tpu.memory_space<vmem>>, %arg2: memref<256x256xbf16, #tpu.memory_space<vmem>>, %arg3: memref<1x256xf32, #tpu.memory_space<vmem>>, %arg4: memref<256x128xf32, #tpu.memory_space<vmem>>) attributes {dimension_semantics = [#tpu.dimension_semantics<parallel>], iteration_bounds = array<i64: 2>, scalar_prefetch = 0 : i64, scratch_operands = 0 : i64, tpu.core_type = #tpu.core_type<tc>, window_params = [{transform_indices = @transform_0, window_bounds = array<i64: 256, 256>}, {pipeline_mode = #tpu.pipeline_mode<synchronous>, transform_indices = @transform_1, window_bounds = array<i64: 256, 256>}, {pipeline_mode = #tpu.pipeline_mode<synchronous>, transform_indices = @transform_2, window_bounds = array<i64: 1, 256>}, {transform_indices = @transform_3, window_bounds = array<i64: 256, 128>}]} {
    %c0 = arith.constant 0 : index
    %c0_0 = arith.constant 0 : index
    %0 = vector.load %arg1[%c0, %c0_0] : memref<256x256xbf16, #tpu.memory_space<vmem>>, vector<256x256xbf16>
    %c0_1 = arith.constant 0 : index
    %c0_2 = arith.constant 0 : index
    %1 = vector.load %arg2[%c0_1, %c0_2] : memref<256x256xbf16, #tpu.memory_space<vmem>>, vector<256x256xbf16>
    %cst = arith.constant dense<0.000000e+00> : vector<256x256xf32>
    %2 = tpu.matmul %0, %1, %cst {dimension_numbers = #tpu.dot_dimension_numbers<[1], [0], [0], [1], [0, 0, 1, 1], [], []>} : vector<256x256xbf16>, vector<256x256xbf16>, vector<256x256xf32> -> vector<256x256xf32>
    %c0_3 = arith.constant 0 : index
    %c0_4 = arith.constant 0 : index
    %3 = vector.load %arg3[%c0_3, %c0_4] : memref<1x256xf32, #tpu.memory_space<vmem>>, vector<1x256xf32>
    %4 = vector.broadcast %3 : vector<1x256xf32> to vector<256x256xf32>
    %5 = arith.addf %2, %4 : vector<256x256xf32>
    %6 = vector.extract_strided_slice %5 {offsets = [0, 0], sizes = [256, 128], strides = [1, 1]} : vector<256x256xf32> to vector<256x128xf32>
    %7 = vector.extract_strided_slice %5 {offsets = [0, 128], sizes = [256, 128], strides = [1, 1]} : vector<256x256xf32> to vector<256x128xf32>
    %cst_5 = arith.constant 0.000000e+00 : f32
    %8 = vector.broadcast %cst_5 : f32 to vector<256x128xf32>
    %9 = arith.cmpf oge, %6, %8 : vector<256x128xf32>
    %cst_6 = arith.constant 0.00999999977 : f32
    %10 = vector.broadcast %cst_6 : f32 to vector<256x128xf32>
    %11 = arith.mulf %10, %6 : vector<256x128xf32>
    %12 = arith.select %9, %6, %11 : vector<256x128xi1>, vector<256x128xf32>
    %cst_7 = arith.constant 0.000000e+00 : f32
    %13 = vector.broadcast %cst_7 : f32 to vector<256x128xf32>
    %14 = arith.subf %13, %7 : vector<256x128xf32>
    %15 = math.exp %14 : vector<256x128xf32>
    %cst_8 = arith.constant 1.000000e+00 : f32
    %16 = vector.broadcast %cst_8 : f32 to vector<256x128xf32>
    %17 = arith.addf %16, %15 : vector<256x128xf32>
    %18 = tpu.reciprocal %17 {approx = true} : vector<256x128xf32> -> vector<256x128xf32>
    %19 = arith.mulf %12, %18 : vector<256x128xf32>
    %c0_9 = arith.constant 0 : index
    %c0_10 = arith.constant 0 : index
    %20 = vector.load %arg4[%c0_9, %c0_10] : memref<256x128xf32, #tpu.memory_space<vmem>>, vector<256x128xf32>
    tpu.vector_store %arg4[%c0_9, %c0_10], %19 {strides = array<i32>} : memref<256x128xf32, #tpu.memory_space<vmem>>, vector<256x128xf32>,
    return
  }
  func.func @transform_0(%arg0: i32) -> (i32, i32) {
    %c0_i32 = arith.constant 0 : i32
    %c0_i32_0 = arith.constant 0 : i32
    return %arg0, %c0_i32 : i32, i32
  }
  func.func @transform_1(%arg0: i32) -> (i32, i32) {
    %c0_i32 = arith.constant 0 : i32
    %c0_i32_0 = arith.constant 0 : i32
    %c0_i32_1 = arith.constant 0 : i32
    return %c0_i32, %c0_i32_0 : i32, i32
  }
  func.func @transform_2(%arg0: i32) -> (i32, i32) {
    %c0_i32 = arith.constant 0 : i32
    %c0_i32_0 = arith.constant 0 : i32
    %c0_i32_1 = arith.constant 0 : i32
    return %c0_i32, %c0_i32_0 : i32, i32
  }
  func.func @transform_3(%arg0: i32) -> (i32, i32) {
    %c0_i32 = arith.constant 0 : i32
    %c0_i32_0 = arith.constant 0 : i32
    return %arg0, %c0_i32 : i32, i32
  }
}

</mosaic_0001>

<bundles_post_ra>
// kernel: tpu_custom_call.1
= control target key start
LH: loop header
LB: loop body
LE: loop exit
PB: predicated region body
PF: predicated region fallthrough
CT: control target
= control target key end

     0   :  { %8 = vsyncpa [#allocation3], 0  ;;  %s2301_s0 = inlined_call_operand.hbm [shape: bf16[512,256], index: 0, kind: input, shape index: {}]   ;;  %s2302_s1 = inlined_call_operand.hbm [shape: bf16[256,256], index: 1, kind: input, shape index: {}]   ;;  %s2303_s2 = inlined_call_operand.vmem [shape: f32[1,256], index: 2, kind: input, shape index: {}]   ;;  %s2304_s3 = inlined_call_operand.hbm [shape: f32[512,128], index: 3, kind: output, shape index: {}]  }
   0x1   :  { %10 = vsyncpa [#allocation3 + $0x1], 0 }
   0x2   :  { %11 = vsyncpa [#allocation6], 0 }
   0x3   :  { %12 = vsyncpa [#allocation4], 0 }
   0x4   :  { %14 = vsyncpa [#allocation4 + $0x1], 0  ;;  %s1771_s12 = smov 0   ;;  %s1773_s13 = smov 0  }
   0x5   :  { %s1775_s14 = smov 0   ;;  %s1777_s15 = smov 0  }
   0x6 LB: > { %s1792_s16 = sadd.s32 4294967295, %s1742_s15   ;;  %s1213_s17 = sadd.s32 4294967294, %s1742_s15   ;;  %s1742_s15 = sphi %s1777_s15, %s2324_s15   ;;  %s1738_s14 = sphi %s1775_s14, %s2323_s14   ;;  %s1734_s13 = sphi %s1773_s13, %s2322_s13   ;;  %s1730_s12 = sphi %s1771_s12, %s2321_s12  }
   0x7   : > { %p40_p0 = scmp.ne.s32.totalorder %s1734_s13, %s1730_s12  ;;  %p2305_p1 = scmp.eq.s32.totalorder %s1792_s16, 0 }
   0x8   : > { %p112_p3 = scmp.eq.s32.totalorder %s1213_s17, 1  ;;  %p1214_p5 = scmp.ge.s32.totalorder %s1742_s15, 1 }
   0x9   : > { %p1801_p4 = por %p2305_p1, %p40_p0  ;;  %p119_p7 = scmp.lt.s32.totalorder %s1742_s15, 3 }
   0xa   : > { %p1806_p6 = por %p112_p3, %p40_p0  ;;  %s1744_s21 = smov [#allocation5]  }
   0xb   : > { %s2308_s18 = scalar_select %p1801_p4, 1, 0 }
   0xc   : > { %s2309_s19 = scalar_select %p1806_p6, 1, 0 }
   0xd   : > { %p1811_p8 = pnand %p1214_p5, %p119_p7  ;;  %s131_s22 = sshll.u32 %s1744_s21, 4  ;;  %s1815_s22 = int_to_ptr.vmem [resolvable:$true] %s131_s22 }
   0xe   : > { %s1827_s24 = sadd.s32 1, %s1742_s15   ;;  %s27_s25 = sadd.s32 1, %s1738_s14 }
   0xf   : > { %s2310_s20 = scalar_select %p1811_p8, 1, 0 }
  0x10   : > { %p1337_p9 = pneg %p1811_p8  ;;  %s24_s26 = ssub.s32 %s1742_s15, %s1827_s24 }
  0x11   : > { %s1614_s29 = scalar_lea.hbm %s2302_s1, 4096 }
  0x12   : > { %p1822_p11 = pnand %p1337_p9, %p2305_p1  ;;  %p1615_p12 = scmp.ne.s32.totalorder %s2302_s1, %s1614_s29 }
  0x13   : > { %p1621_p5 = scmp.lt.u32.totalorder %s1614_s29, %s2302_s1 }
  0x14   : > { %p1616_p13 = pneg %p1822_p11 }
  0x16   : > { %p1617_p0 = pnand %p1616_p13, %p1615_p12 }
  0x18   : > { %p1618_p3 = pneg %p1617_p0 }
  0x1a   : > { %p1623_p7 = pnand %p1621_p5, %p1618_p3 }
  0x1c   : > { %1626 = shalt.err (!%p1623_p7)
}
  0x1d   : > { %s1627_s7 = scalar_lea.vmem %s1815_s22, 4096  ;;  %p1635_p2 = scmp.lt.s32.totalorder %s1815_s22, %s1815_s22 }
  0x1e   : > { %p1628_p9 = scmp.ne.s32.totalorder %s1815_s22, %s1627_s7  ;;  %p1636_p6 = scmp.lt.s32.totalorder %s1627_s7, %s1627_s7 }
  0x20   : > { %p1630_p10 = pnand %p1628_p9, %p1616_p13  ;;  %p1637_p4 = por %p1636_p6, %p1635_p2 }
  0x22   : > { %p1631_p1 = pneg %p1630_p10 }
  0x24   : > { %p1638_p8 = pnand %p1637_p4, %p1631_p1 }
  0x26   : > { %1641 = shalt.err (!%p1638_p8)
}
  0x27   : > { %s1745_s8 = smov 128   ;;  %s1746_s9 = smov 8  }
  0x28   : > { %1340 = dma.hbm_to_vmem [thread:$0]  (!%p1822_p11), %s2302_s1, 4096, %s1815_s22, [#allocation6], %s1745_s8, %s1745_s8, %s1746_s9  }
  0x29   : > { %p25_p1 = scmp.eq.s32.totalorder %s24_s26, 0  ;;  %p34_p2 = scmp.ne.s32.totalorder %s1738_s14, %s1734_s13 }
  0x2a   : > { %p35_p4 = scmp.eq.s32.totalorder %s1742_s15, 0  ;;  %p1350_p6 = scmp.lt.s32.totalorder %s1742_s15, 2 }
  0x2b   : > { %s1861_s17 = scalar_select %p25_p1, %s1738_s14, %s27_s25  }
  0x2c   : > { %p36_p8 = por %p35_p4, %p34_p2  ;;  %p2312_p10 = scmp.eq.s32.totalorder %s1792_s16, 1 }
  0x2d   : > { %s148_s23 = sand.u32 1, %s1738_s14   ;;  %s1295_s27 = sshll.u32 %s1742_s15, 12 }
  0x2e   : > { %p1865_p12 = por %p2312_p10, %p34_p2  ;;  %s1217_s28 = sshll.u32 %s148_s23, 8 }
  0x2f   : > { %s1874_s4 = scalar_lea.hbm %s2301_s0, %s1295_s27  ;;  %s152_s22 = scalar_lea.vmem [#allocation2], %s1217_s28 }
  0x30   : > { %s160_s25 = sshll.u32 %s152_s22, 4  ;;  %p1876_p11 = pnand %p1350_p6, %p36_p8  ;;  %s1880_s25 = int_to_ptr.vmem [resolvable:$true] %s160_s25 }
  0x31   : > { %s1882_s5 = scalar_lea.sflag [#allocation3], %s148_s23  ;;  %s1642_s6 = scalar_lea.hbm %s1874_s4, 4096 }
  0x32   : > { %p1643_p13 = scmp.ne.s32.totalorder %s1874_s4, %s1642_s6  ;;  %p1644_p0 = pneg %p1876_p11 }
  0x33   : > { %s1647_s11 = scalar_lea.hbm %s2301_s0, 8192  ;;  %p1648_p7 = scmp.lt.u32.totalorder %s1874_s4, %s2301_s0 }
  0x34   : > { %p1645_p3 = pnand %p1644_p0, %p1643_p13  ;;  %p1649_p9 = scmp.lt.u32.totalorder %s1647_s11, %s1642_s6 }
  0x35   : > { %p1651_p2 = scmp.lt.u32.totalorder %s1642_s6, %s1874_s4 }
  0x36   : > { %p1646_p5 = pneg %p1645_p3  ;;  %p1650_p1 = por %p1649_p9, %p1648_p7 }
  0x38   : > { %p1652_p4 = por %p1651_p2, %p1650_p1 }
  0x3a   : > { %p1653_p6 = pnand %p1652_p4, %p1646_p5 }
  0x3c   : > { %1656 = shalt.err (!%p1653_p6)
}
  0x3d   : > { %s1657_s23 = scalar_lea.vmem %s1880_s25, 4096  ;;  %s1747_s29 = smov [#allocation2]  }
  0x3e   : > { %p1658_p8 = scmp.ne.s32.totalorder %s1880_s25, %s1657_s23  ;;  %s1662_s30 = sshll.u32 %s1747_s29, 4  ;;  %s1663_s30 = int_to_ptr.vmem [resolvable:$false] %s1662_s30 }
  0x3f   : > { %s1664_s22 = scalar_lea.vmem %s1663_s30, 8192  ;;  %p1665_p3 = scmp.lt.s32.totalorder %s1880_s25, %s1663_s30 }
  0x40   : > { %p1660_p10 = pnand %p1658_p8, %p1644_p0  ;;  %p1666_p7 = scmp.lt.s32.totalorder %s1664_s22, %s1657_s23 }
  0x42   : > { %p1661_p13 = pneg %p1660_p10  ;;  %p1667_p9 = por %p1666_p7, %p1665_p3 }
  0x44   : > { %p1668_p1 = pnand %p1667_p9, %p1661_p13 }
  0x46   : > { %1671 = shalt.err (!%p1668_p1)
}
  0x47   : > { %1344 = dma.hbm_to_vmem [thread:$0]  (!%p1876_p11), %s1874_s4, 4096, %s1880_s25, %s1882_s5, %s1745_s8, %s1745_s8, %s1746_s9  }
  0x48   : > { %p2315_p0 = scmp.ne.s32.totalorder %s2310_s20, 0 }
  0x49   : > { %s1916_s6 = sand.u32 (!%p2315_p0), 1, %s1734_s13   ;;  %p2316_p5 = scmp.ne.s32.totalorder (!%p2315_p0), %s2308_s18, 0 }
  0x4a   : > { %172 = sbr.rel (%p2315_p0) target bundleno = 490 (0x1ea), region = 32  ;;  %s1222_s7 = sshll.u32 (!%p2315_p0), %s1916_s6, 8 }
  0x4b   : > { %s175_s10 = scalar_lea.sflag (!%p2315_p0), [#allocation3], %s1916_s6  ;;  %s1922_s26 = scalar_lea.vmem (!%p2315_p0), [#allocation2], %s1222_s7 }
  0x51   : > { %1717 = dma.done.wait (%p2316_p5), %s175_s10, 4096  }
  0x52   : > { %1719 = vsyncadd (%p2316_p5), %s175_s10, 4294963200  ;;  %p2317_p11 = scmp.eq.s32.totalorder %s1792_s16, 0 }
  0x54   : > { %1721 = dma.done.wait (%p2317_p11), [#allocation6], 4096   ;;  %p2318_p2 = pmov %p2317_p11 }
  0x55   : > { %v1390_v0 = vld [vmem:[#allocation5 + $0x4] ss:$8 sps:$4 sm:$0xff]   ;;  %v1392_v1 = vld [vmem:[#allocation5] ss:$8 sps:$4 sm:$0xff]   ;;  %v1393_v2 = vld [vmem:[#allocation5 + $0x14] ss:$8 sps:$4 sm:$0xff]  }
  0x56   : > { %1723 = vsyncadd (%p2318_p2), [#allocation6], 4294963200  ;;  %603 = vmatprep.subr.bf16.mxu0 %v1390_v0  ;;  %1297 = vmatprep.subr.bf16.mxu1 %v1390_v0  ;;  %v1395_v3 = vld [vmem:[#allocation5 + $0x10] ss:$8 sps:$4 sm:$0xff]   ;;  %v1396_v4 = vld [vmem:[#allocation5 + $0x24] ss:$8 sps:$4 sm:$0xff]   ;;  %v273_v0 = vlaneseq }
  0x57   : > { %604 = vmatpush1.bf16.msra.mxu0 %v1392_v1  ;;  %1313 = vmatpush1.bf16.msra.mxu1 %v1392_v1  ;;  %v1398_v5 = vld [vmem:[#allocation5 + $0x20] ss:$8 sps:$4 sm:$0xff]   ;;  %v1399_v6 = vld [vmem:[#allocation5 + $0x34] ss:$8 sps:$4 sm:$0xff]   ;;  %v1401_v7 = vld [vmem:[#allocation5 + $0x30] ss:$8 sps:$4 sm:$0xff]  }
  0x58   : > { %605 = vmatprep.subr.bf16.mxu0 %v1393_v2  ;;  %1298 = vmatprep.subr.bf16.mxu1 %v1393_v2  ;;  %v1402_v8 = vld [vmem:[#allocation5 + $0x44] ss:$8 sps:$4 sm:$0xff]   ;;  %v1404_v9 = vld [vmem:[#allocation5 + $0x40] ss:$8 sps:$4 sm:$0xff]   ;;  %v1405_v10 = vld [vmem:[#allocation5 + $0x54] ss:$8 sps:$4 sm:$0xff]  }
  0x59   : > { %v1407_v11 = vld [vmem:[#allocation5 + $0x50] ss:$8 sps:$4 sm:$0xff]   ;;  %v1408_v12 = vld [vmem:[#allocation5 + $0x64] ss:$8 sps:$4 sm:$0xff]   ;;  %v1410_v14 = vld [vmem:[#allocation5 + $0x60] ss:$8 sps:$4 sm:$0xff]  }
  0x5a   : > { %v1440_v13 = vld [vmem:[%s1922_s26 + $0x4] ss:$8 sps:$4 sm:$0xff]   ;;  %v1411_v16 = vld [vmem:[#allocation5 + $0x74] ss:$8 sps:$4 sm:$0xff]   ;;  %v1413_v17 = vld [vmem:[#allocation5 + $0x70] ss:$8 sps:$4 sm:$0xff]  }
  0x5b   : > { %606 = vmatpush1.bf16.msra.mxu0 %v1395_v3  ;;  %1314 = vmatpush1.bf16.msra.mxu1 %v1395_v3  ;;  %v1443_v15 = vld [vmem:[%s1922_s26 + $0x84] ss:$8 sps:$4 sm:$0xff]   ;;  %v1416_v19 = vld [vmem:[#allocation5 + $0x80] ss:$8 sps:$4 sm:$0xff]   ;;  %v1417_v20 = vld [vmem:[#allocation5 + $0x94] ss:$8 sps:$4 sm:$0xff]  }
  0x5c   : > { %607 = vmatprep.subr.bf16.mxu0 %v1396_v4  ;;  %1299 = vmatprep.subr.bf16.mxu1 %v1396_v4  ;;  %v1414_v18 = vld [vmem:[#allocation5 + $0x84] ss:$8 sps:$4 sm:$0xff]   ;;  %v1419_v21 = vld [vmem:[#allocation5 + $0x90] ss:$8 sps:$4 sm:$0xff]   ;;  %v1422_v23 = vld [vmem:[#allocation5 + $0xa0] ss:$8 sps:$4 sm:$0xff]  }
  0x5d   : > { %635 = vmatprep.mubr.bf16.mxu0 %v1440_v13  ;;  %715 = vmatprep.mubr.bf16.mxu1 %v1443_v15  ;;  %v1420_v22 = vld [vmem:[#allocation5 + $0xa4] ss:$8 sps:$4 sm:$0xff]   ;;  %v1423_v24 = vld [vmem:[#allocation5 + $0xb4] ss:$8 sps:$4 sm:$0xff]   ;;  %v1425_v25 = vld [vmem:[#allocation5 + $0xb0] ss:$8 sps:$4 sm:$0xff]  }
  0x5e   : > { %v1426_v26 = vld [vmem:[#allocation5 + $0xc4] ss:$8 sps:$4 sm:$0xff]   ;;  %v1428_v27 = vld [vmem:[#allocation5 + $0xc0] ss:$8 sps:$4 sm:$0xff]   ;;  %v1429_v28 = vld [vmem:[#allocation5 + $0xd4] ss:$8 sps:$4 sm:$0xff]  }
  0x5f   : > { %608 = vmatpush1.bf16.msra.mxu0 %v1398_v5  ;;  %1315 = vmatpush1.bf16.msra.mxu1 %v1398_v5  ;;  %v1431_v29 = vld [vmem:[#allocation5 + $0xd0] ss:$8 sps:$4 sm:$0xff]   ;;  %v1432_v30 = vld [vmem:[#allocation5 + $0xe4] ss:$8 sps:$4 sm:$0xff]   ;;  %v1434_v31 = vld [vmem:[#allocation5 + $0xe0] ss:$8 sps:$4 sm:$0xff]  }
  0x60   : > { %609 = vmatprep.subr.bf16.mxu0 %v1399_v6  ;;  %1300 = vmatprep.subr.bf16.mxu1 %v1399_v6  ;;  %v1435_v32 = vld [vmem:[#allocation5 + $0xf4] ss:$8 sps:$4 sm:$0xff]   ;;  %v1437_v33 = vld [vmem:[#allocation5 + $0xf0] ss:$8 sps:$4 sm:$0xff]   ;;  %v1438_v34 = vld [vmem:[%s1922_s26] ss:$8 sps:$4 sm:$0xff]  }
  0x61   : > { %v1441_v35 = vld [vmem:[%s1922_s26 + $0x80] ss:$8 sps:$4 sm:$0xff]   ;;  %v1444_v36 = vld [vmem:[%s1922_s26 + $0x14] ss:$8 sps:$4 sm:$0xff]   ;;  %v1448_v38 = vld [vmem:[%s1922_s26 + $0x10] ss:$8 sps:$4 sm:$0xff]  }
  0x62   : > { %v1446_v37 = vld [vmem:[%s1922_s26 + $0x94] ss:$8 sps:$4 sm:$0xff]   ;;  %v1449_v39 = vld [vmem:[%s1922_s26 + $0x90] ss:$8 sps:$4 sm:$0xff]   ;;  %v1450_v40 = vld [vmem:[%s1922_s26 + $0x24] ss:$8 sps:$4 sm:$0xff]  }
  0x63   : > { %610 = vmatpush1.bf16.msra.mxu0 %v1401_v7  ;;  %1316 = vmatpush1.bf16.msra.mxu1 %v1401_v7  ;;  %v1452_v41 = vld [vmem:[%s1922_s26 + $0xa4] ss:$8 sps:$4 sm:$0xff]   ;;  %v1454_v42 = vld [vmem:[%s1922_s26 + $0x20] ss:$8 sps:$4 sm:$0xff]   ;;  %v1456_v44 = vld [vmem:[%s1922_s26 + $0x34] ss:$8 sps:$4 sm:$0xff]  }
  0x64   : > { %611 = vmatprep.subr.bf16.mxu0 %v1402_v8  ;;  %1301 = vmatprep.subr.bf16.mxu1 %v1402_v8  ;;  %v1455_v43 = vld [vmem:[%s1922_s26 + $0xa0] ss:$8 sps:$4 sm:$0xff]   ;;  %v1458_v45 = vld [vmem:[%s1922_s26 + $0xb4] ss:$8 sps:$4 sm:$0xff]   ;;  %v1460_v46 = vld [vmem:[%s1922_s26 + $0x30] ss:$8 sps:$4 sm:$0xff]  }
  0x65   : > { %v1461_v47 = vld [vmem:[%s1922_s26 + $0xb0] ss:$8 sps:$4 sm:$0xff]   ;;  %v1462_v48 = vld [vmem:[%s1922_s26 + $0x44] ss:$8 sps:$4 sm:$0xff]   ;;  %v1466_v50 = vld [vmem:[%s1922_s26 + $0x40] ss:$8 sps:$4 sm:$0xff]  }
  0x66   : > { %v1464_v49 = vld [vmem:[%s1922_s26 + $0xc4] ss:$8 sps:$4 sm:$0xff]   ;;  %v1467_v51 = vld [vmem:[%s1922_s26 + $0xc0] ss:$8 sps:$4 sm:$0xff]   ;;  %v1468_v52 = vld [vmem:[%s1922_s26 + $0x54] ss:$8 sps:$4 sm:$0xff]  }
  0x67   : > { %612 = vmatpush1.bf16.msra.mxu0 %v1404_v9  ;;  %1317 = vmatpush1.bf16.msra.mxu1 %v1404_v9  ;;  %v1470_v53 = vld [vmem:[%s1922_s26 + $0xd4] ss:$8 sps:$4 sm:$0xff]   ;;  %v1472_v54 = vld [vmem:[%s1922_s26 + $0x50] ss:$8 sps:$4 sm:$0xff]   ;;  %v1474_v56 = vld [vmem:[%s1922_s26 + $0x64] ss:$8 sps:$4 sm:$0xff]  }
  0x68   : > { %613 = vmatprep.subr.bf16.mxu0 %v1405_v10  ;;  %1302 = vmatprep.subr.bf16.mxu1 %v1405_v10  ;;  %v1473_v55 = vld [vmem:[%s1922_s26 + $0xd0] ss:$8 sps:$4 sm:$0xff]   ;;  %v1476_v57 = vld [vmem:[%s1922_s26 + $0xe4] ss:$8 sps:$4 sm:$0xff]   ;;  %v1478_v58 = vld [vmem:[%s1922_s26 + $0x60] ss:$8 sps:$4 sm:$0xff]  }
  0x69   : > { %v1479_v59 = vld [vmem:[%s1922_s26 + $0xe0] ss:$8 sps:$4 sm:$0xff]   ;;  %v1480_v60 = vld [vmem:[%s1922_s26 + $0x74] ss:$8 sps:$4 sm:$0xff]   ;;  %v1484_v62 = vld [vmem:[%s1922_s26 + $0x70] ss:$8 sps:$4 sm:$0xff]  }
  0x6a   : > { %v1482_v61 = vld [vmem:[%s1922_s26 + $0xf4] ss:$8 sps:$4 sm:$0xff]   ;;  %v1485_v63 = vld [vmem:[%s1922_s26 + $0xf0] ss:$8 sps:$4 sm:$0xff]   ;;  %v274_v1 = vshrl.u32 %v273_v0, 7  ;;  %s2048_s8 = scalar_lea.vmem [#allocation7], %s1222_s7 }
  0x6b   : > { %614 = vmatpush1.bf16.msra.mxu0 %v1407_v11  ;;  %1318 = vmatpush1.bf16.msra.mxu1 %v1407_v11  ;;  %v271_v3 = vld [vmem:[%s2303_s2] sm:$0x3]  ;;  %s1296_s9 = sshll.u32 %s1792_s16, 12  ;;  %s1130_s4 = sshll.u32 %s2048_s8, 4  ;;  %s2255_s4 = int_to_ptr.vmem [resolvable:$true] %s1130_s4 }
  0x6c   : > { %615 = vmatprep.subr.bf16.mxu0 %v1408_v12  ;;  %1303 = vmatprep.subr.bf16.mxu1 %v1408_v12  ;;  %v279_v2 = vsub.s32 1, %v274_v1  ;;  %s2253_s11 = scalar_lea.hbm %s2304_s3, %s1296_s9  ;;  %s1117_s16 = scalar_lea.sflag [#allocation4], %s1916_s6 }
  0x6d   : > { %s1672_s27 = scalar_lea.vmem %s2255_s4, 4096  ;;  %s1748_s28 = smov [#allocation7]  }
  0x6e   : > { %v1967_v4 = vrot.slane %v271_v3, %v279_v2  ;;  %p1673_p4 = scmp.ne.s32.totalorder %s2255_s4, %s1672_s27  ;;  %s1676_s23 = sshll.u32 %s1748_s28, 4  ;;  %s1677_s23 = int_to_ptr.vmem [resolvable:$false] %s1676_s23 }
  0x6f   : > { %616 = vmatpush1.bf16.msra.mxu0 %v1410_v14  ;;  %1319 = vmatpush1.bf16.msra.mxu1 %v1410_v14  ;;  %s1678_s29 = scalar_lea.vmem %s1677_s23, 8192  ;;  %p1679_p10 = scmp.lt.s32.totalorder %s2255_s4, %s1677_s23 }
  0x70   : > { %617 = vmatprep.subr.bf16.mxu0 %v1411_v16  ;;  %1304 = vmatprep.subr.bf16.mxu1 %v1411_v16  ;;  %p1674_p6 = pnand %p1673_p4, %p1865_p12  ;;  %p1680_p13 = scmp.lt.s32.totalorder %s1678_s29, %s1672_s27 }
  0x72   : > { %p1675_p8 = pneg %p1674_p6  ;;  %p1681_p3 = por %p1680_p13, %p1679_p10 }
  0x73   : > { %618 = vmatpush1.bf16.msra.mxu0 %v1413_v17  ;;  %1320 = vmatpush1.bf16.msra.mxu1 %v1413_v17 }
  0x74   : > { %619 = vmatprep.subr.bf16.mxu0 %v1414_v18  ;;  %1305 = vmatprep.subr.bf16.mxu1 %v1414_v18  ;;  %p1682_p7 = pnand %p1681_p3, %p1675_p8 }
  0x77   : > { %620 = vmatpush1.bf16.msra.mxu0 %v1416_v19  ;;  %1321 = vmatpush1.bf16.msra.mxu1 %v1416_v19 }
  0x78   : > { %621 = vmatprep.subr.bf16.mxu0 %v1417_v20  ;;  %1306 = vmatprep.subr.bf16.mxu1 %v1417_v20 }
  0x7b   : > { %622 = vmatpush1.bf16.msra.mxu0 %v1419_v21  ;;  %1322 = vmatpush1.bf16.msra.mxu1 %v1419_v21 }
  0x7c   : > { %623 = vmatprep.subr.bf16.mxu0 %v1420_v22  ;;  %1307 = vmatprep.subr.bf16.mxu1 %v1420_v22 }
  0x7f   : > { %624 = vmatpush1.bf16.msra.mxu0 %v1422_v23  ;;  %1323 = vmatpush1.bf16.msra.mxu1 %v1422_v23  ;;  %v275_v23 = vsub.s32 0, %v274_v1 }
  0x80   : > { %625 = vmatprep.subr.bf16.mxu0 %v1423_v24  ;;  %1308 = vmatprep.subr.bf16.mxu1 %v1423_v24 }
  0x83   : > { %626 = vmatpush1.bf16.msra.mxu0 %v1425_v25  ;;  %1324 = vmatpush1.bf16.msra.mxu1 %v1425_v25 }
  0x84   : > { %627 = vmatprep.subr.bf16.mxu0 %v1426_v26  ;;  %1309 = vmatprep.subr.bf16.mxu1 %v1426_v26 }
  0x87   : > { %628 = vmatpush1.bf16.msra.mxu0 %v1428_v27  ;;  %1325 = vmatpush1.bf16.msra.mxu1 %v1428_v27 }
  0x88   : > { %629 = vmatprep.subr.bf16.mxu0 %v1429_v28  ;;  %1310 = vmatprep.subr.bf16.mxu1 %v1429_v28 }
  0x8b   : > { %630 = vmatpush1.bf16.msra.mxu0 %v1431_v29  ;;  %1326 = vmatpush1.bf16.msra.mxu1 %v1431_v29 }
  0x8c   : > { %631 = vmatprep.subr.bf16.mxu0 %v1432_v30  ;;  %1311 = vmatprep.subr.bf16.mxu1 %v1432_v30 }
  0x8f   : > { %632 = vmatpush1.bf16.msra.mxu0 %v1434_v31  ;;  %1327 = vmatpush1.bf16.msra.mxu1 %v1434_v31 }
  0x90   : > { %633 = vmatprep.subr.bf16.mxu0 %v1435_v32  ;;  %1312 = vmatprep.subr.bf16.mxu1 %v1435_v32 }
  0x93   : > { %634 = vmatpush1.bf16.msra.mxu0 %v1437_v33  ;;  %1328 = vmatpush1.bf16.msra.mxu1 %v1437_v33 }
  0x96   : > { %636 = vmatmul.mubr.bf16.vlgmr.msra.gmra.mrb[0].mxu0 %v1438_v34  ;;  %716 = vmatmul.mubr.bf16.vlgmr.msra.gmra.mrb[0].mxu1 %v1441_v35 }
  0x97   : > { %645 = vmatprep.mubr.bf16.mxu0 %v1444_v36  ;;  %725 = vmatprep.mubr.bf16.mxu1 %v1446_v37  ;;  %v1985_v36 = vrot.slane %v271_v3, %v275_v23 }
  0x9e   : > { %646 = vmatmul.mubr.bf16.gmra.mrb[4].mxu0 %v1448_v38  ;;  %726 = vmatmul.mubr.bf16.gmra.mrb[4].mxu1 %v1449_v39 }
  0x9f   : > { %655 = vmatprep.mubr.bf16.mxu0 %v1450_v40  ;;  %735 = vmatprep.mubr.bf16.mxu1 %v1452_v41 }
  0xa6   : > { %656 = vmatmul.mubr.bf16.gmra.mrb[8].mxu0 %v1454_v42  ;;  %736 = vmatmul.mubr.bf16.gmra.mrb[8].mxu1 %v1455_v43 }
  0xa7   : > { %665 = vmatprep.mubr.bf16.mxu0 %v1456_v44  ;;  %745 = vmatprep.mubr.bf16.mxu1 %v1458_v45 }
  0xae   : > { %666 = vmatmul.mubr.bf16.gmra.mrb[12].mxu0 %v1460_v46  ;;  %746 = vmatmul.mubr.bf16.gmra.mrb[12].mxu1 %v1461_v47 }
  0xaf   : > { %675 = vmatprep.mubr.bf16.mxu0 %v1462_v48  ;;  %755 = vmatprep.mubr.bf16.mxu1 %v1464_v49 }
  0xb6   : > { %676 = vmatmul.mubr.bf16.gmra.mrb[16].mxu0 %v1466_v50  ;;  %756 = vmatmul.mubr.bf16.gmra.mrb[16].mxu1 %v1467_v51 }
  0xb7   : > { %685 = vmatprep.mubr.bf16.mxu0 %v1468_v52  ;;  %765 = vmatprep.mubr.bf16.mxu1 %v1470_v53 }
  0xbe   : > { %686 = vmatmul.mubr.bf16.gmra.mrb[20].mxu0 %v1472_v54  ;;  %766 = vmatmul.mubr.bf16.gmra.mrb[20].mxu1 %v1473_v55 }
  0xbf   : > { %695 = vmatprep.mubr.bf16.mxu0 %v1474_v56  ;;  %775 = vmatprep.mubr.bf16.mxu1 %v1476_v57 }
  0xc6   : > { %696 = vmatmul.mubr.bf16.gmra.mrb[24].mxu0 %v1478_v58  ;;  %776 = vmatmul.mubr.bf16.gmra.mrb[24].mxu1 %v1479_v59 }
  0xc7   : > { %705 = vmatprep.mubr.bf16.mxu0 %v1480_v60  ;;  %785 = vmatprep.mubr.bf16.mxu1 %v1482_v61 }
  0xce   : > { %706 = vmatmul.mubr.bf16.gmra.mrb[28].mxu0 %v1484_v62  ;;  %786 = vmatmul.mubr.bf16.gmra.mrb[28].mxu1 %v1485_v63 }
 0x169   : > { %v637_v5 = vpop.f32.mrb[0].mxu0  ;;  %v717_v6 = vpop.f32.mrb[0].mxu1 }
 0x16a   : > { %v639_v7 = vpop.f32.mrb[1].mxu0  ;;  %v719_v8 = vpop.f32.mrb[1].mxu1  ;;  %v638_v42 = vadd.f32 %v637_v5, %v1985_v36  ;;  %v718_v46 = vadd.f32 %v717_v6, %v1985_v36 }
 0x16b   : > { %v640_v9 = vadd.f32 %v639_v7, %v1967_v4  ;;  %v720_v10 = vadd.f32 %v719_v8, %v1967_v4  ;;  %v641_v11 = vpop.f32.mrb[2].mxu0  ;;  %v1971_v12 = vpop.f32.mrb[2].mxu1 }
 0x16c   : > { %v643_v15 = vpop.f32.mrb[3].mxu0  ;;  %v723_v16 = vpop.f32.mrb[3].mxu1  ;;  %vm796_vm0 = vcmp.ge.f32.partialorder %v638_v42, 0.0  ;;  %v828_v59 = vmul.f32 0.01, %v638_v42  ;;  %v642_v61 = vadd.f32 %v641_v11, %v1985_v36  ;;  %v2004_v6 = vadd.f32 %v1971_v12, %v1985_v36 }
 0x16d   : > { %v892_v13 = vsub.f32 0.0, %v640_v9  ;;  %v908_v14 = vsub.f32 0.0, %v720_v10  ;;  %v644_v17 = vadd.f32 %v643_v15, %v1967_v4  ;;  %v724_v18 = vadd.f32 %v723_v16, %v1967_v4 }
 0x16e   : > { %v844_v63 = vmul.f32 0.01, %v718_v46  ;;  %vm812_vm1 = vcmp.ge.f32.partialorder %v718_v46, 0.0  ;;  %v860_v11 = vsel %vm796_vm0, %v638_v42, %v828_v59  ;;  %vm797_vm2 = vcmp.ge.f32.partialorder %v642_v61, 0.0 }
 0x16f   : > { %v924_v19 = vmul.f32 1.442695, %v892_v13  ;;  %v956_v20 = vmul.f32 1.442695, %v908_v14  ;;  %v893_v21 = vsub.f32 0.0, %v644_v17  ;;  %v909_v22 = vsub.f32 0.0, %v724_v18 }
 0x170   : > { %v829_v13 = vmul.f32 0.01, %v642_v61  ;;  %vm813_vm3 = vcmp.ge.f32.partialorder %v2004_v6, 0.0 }
 0x171   : > { %1486 = vpow2.f32 %v924_v19  ;;  %v1975_v24 = vpop.f32.mrb[4].mxu0  ;;  %v1977_v25 = vpop.f32.mrb[4].mxu1  ;;  %v926_v26 = vmul.f32 1.442695, %v893_v21  ;;  %v958_v29 = vmul.f32 1.442695, %v909_v22 }
 0x172   : > { %1488 = vpow2.f32 %v956_v20  ;;  %v649_v27 = vpop.f32.mrb[5].mxu0  ;;  %v729_v28 = vpop.f32.mrb[5].mxu1  ;;  %v876_v20 = vsel %vm812_vm1, %v718_v46, %v844_v63  ;;  %v648_v21 = vadd.f32 %v1975_v24, %v1985_v36  ;;  %v845_v24 = vmul.f32 0.01, %v2004_v6 }
 0x173   : > { %v650_v30 = vadd.f32 %v649_v27, %v1967_v4  ;;  %v1980_v31 = vpop.f32.mrb[6].mxu0  ;;  %v1982_v32 = vpop.f32.mrb[6].mxu1  ;;  %1490 = vpow2.f32 %v926_v26  ;;  %v730_v33 = vadd.f32 %v729_v28, %v1967_v4  ;;  %v2023_v27 = vadd.f32 %v1977_v25, %v1985_v36 }
 0x174   : > { %v653_v34 = vpop.f32.mrb[7].mxu0  ;;  %v733_v35 = vpop.f32.mrb[7].mxu1  ;;  %1492 = vpow2.f32 %v958_v29  ;;  %vm798_vm4 = vcmp.ge.f32.partialorder %v648_v21, 0.0 }
 0x175   : > { %v894_v37 = vsub.f32 0.0, %v650_v30  ;;  %v910_v38 = vsub.f32 0.0, %v730_v33  ;;  %v654_v41 = vadd.f32 %v653_v34, %v1967_v4  ;;  %v734_v43 = vadd.f32 %v733_v35, %v1967_v4 }
 0x176   : > { %v861_v35 = vsel %vm797_vm2, %v642_v61, %v829_v13  ;;  %vm814_vm5 = vcmp.ge.f32.partialorder %v2023_v27, 0.0 }
 0x177   : > { %v928_v39 = vmul.f32 1.442695, %v894_v37  ;;  %v960_v40 = vmul.f32 1.442695, %v910_v38  ;;  %v895_v47 = vsub.f32 0.0, %v654_v41  ;;  %v911_v51 = vsub.f32 0.0, %v734_v43 }
 0x178   : > { %v2033_v41 = vadd.f32 %v1982_v32, %v1985_v36 }
 0x179   : > { %v1990_v44 = vpop.f32.mrb[8].mxu0  ;;  %v1992_v45 = vpop.f32.mrb[8].mxu1  ;;  %1494 = vpow2.f32 %v928_v39  ;;  %v930_v58 = vmul.f32 1.442695, %v895_v47  ;;  %v962_v8 = vmul.f32 1.442695, %v911_v51  ;;  %v2029_v39 = vadd.f32 %v1980_v31, %v1985_v36 }
 0x17a   : > { %v659_v48 = vpop.f32.mrb[9].mxu0  ;;  %v739_v49 = vpop.f32.mrb[9].mxu1  ;;  %1496 = vpow2.f32 %v960_v40  ;;  %v830_v47 = vmul.f32 0.01, %v648_v21  ;;  %vm815_vm7 = vcmp.ge.f32.partialorder %v2033_v41, 0.0 }
 0x17b   : > { %v1487_v50 = vpop.eup %1486  ;;  %v660_v52 = vadd.f32 %v659_v48, %v1967_v4  ;;  %v740_v53 = vadd.f32 %v739_v49, %v1967_v4  ;;  %v1997_v54 = vpop.f32.mrb[10].mxu0  ;;  %vm799_vm6 = vcmp.ge.f32.partialorder %v2029_v39, 0.0 }
 0x17c   : > { %v1999_v55 = vpop.f32.mrb[10].mxu1  ;;  %v1489_v56 = vpop.eup %1488  ;;  %v988_v57 = vadd.f32 1.0, %v1487_v50 }
 0x17d   : > { %v1004_v60 = vadd.f32 1.0, %v1489_v56  ;;  %v1491_v62 = vpop.eup %1490  ;;  %v896_v0 = vsub.f32 0.0, %v660_v52  ;;  %v912_v1 = vsub.f32 0.0, %v740_v53  ;;  %v663_v2 = vpop.f32.mrb[11].mxu0  ;;  %v846_v56 = vmul.f32 0.01, %v2023_v27 }
 0x17e   : > { %1498 = vrcp.f32 %v988_v57  ;;  %v743_v3 = vpop.f32.mrb[11].mxu1  ;;  %v1493_v5 = vpop.eup %1492  ;;  %v989_v7 = vadd.f32 1.0, %v1491_v62  ;;  %v664_v12 = vadd.f32 %v663_v2, %v1967_v4 }
 0x17f   : > { %1500 = vrcp.f32 %v1004_v60  ;;  %v1005_v9 = vadd.f32 1.0, %v1493_v5  ;;  %v932_v10 = vmul.f32 1.442695, %v896_v0  ;;  %v964_v14 = vmul.f32 1.442695, %v912_v1 }
 0x180   : > { %1502 = vpow2.f32 %v930_v58  ;;  %v744_v17 = vadd.f32 %v743_v3, %v1967_v4  ;;  %v897_v28 = vsub.f32 0.0, %v664_v12  ;;  %v877_v60 = vsel %vm813_vm3, %v2004_v6, %v845_v24 }
 0x181   : > { %1504 = vrcp.f32 %v989_v7  ;;  %v2007_v15 = vpop.f32.mrb[12].mxu0  ;;  %v2009_v16 = vpop.f32.mrb[12].mxu1  ;;  %v862_v3 = vsel %vm798_vm4, %v648_v21, %v830_v47  ;;  %v662_v47 = vadd.f32 %v1997_v54, %v1985_v36 }
 0x182   : > { %1506 = vrcp.f32 %v1005_v9  ;;  %v669_v18 = vpop.f32.mrb[13].mxu0  ;;  %v749_v19 = vpop.f32.mrb[13].mxu1  ;;  %v913_v29 = vsub.f32 0.0, %v744_v17  ;;  %v934_v40 = vmul.f32 1.442695, %v897_v28  ;;  %v658_v17 = vadd.f32 %v1990_v44, %v1985_v36 }
 0x183   : > { %1508 = vpow2.f32 %v962_v8  ;;  %v2017_v22 = vpop.f32.mrb[14].mxu0  ;;  %v2019_v23 = vpop.f32.mrb[14].mxu1  ;;  %v670_v42 = vadd.f32 %v669_v18, %v1967_v4  ;;  %v750_v43 = vadd.f32 %v749_v19, %v1967_v4  ;;  %v878_v28 = vsel %vm814_vm5, %v2023_v27, %v846_v56 }
 0x184   : > { %v1495_v26 = vpop.eup %1494  ;;  %1510 = vpow2.f32 %v932_v10  ;;  %v673_v30 = vpop.f32.mrb[15].mxu0  ;;  %v966_v25 = vmul.f32 1.442695, %v913_v29  ;;  %v738_v44 = vadd.f32 %v1992_v45, %v1985_v36  ;;  %vm800_vm8 = vcmp.ge.f32.partialorder %v658_v17, 0.0 }
 0x185   : > { %v753_v33 = vpop.f32.mrb[15].mxu1  ;;  %v1497_v34 = vpop.eup %1496  ;;  %v990_v37 = vadd.f32 1.0, %v1495_v26  ;;  %1512 = vpow2.f32 %v964_v14  ;;  %v898_v49 = vsub.f32 0.0, %v670_v42  ;;  %v914_v50 = vsub.f32 0.0, %v750_v43 }
 0x186   : > { %v1006_v38 = vadd.f32 1.0, %v1497_v34  ;;  %v674_v5 = vadd.f32 %v673_v30, %v1967_v4  ;;  %v754_v7 = vadd.f32 %v753_v33, %v1967_v4  ;;  %vm816_vm9 = vcmp.ge.f32.partialorder %v738_v44, 0.0 }
 0x187   : > { %1514 = vrcp.f32 %v990_v37  ;;  %v936_v62 = vmul.f32 1.442695, %v898_v49  ;;  %v968_v63 = vmul.f32 1.442695, %v914_v50  ;;  %vm801_vm10 = vcmp.ge.f32.partialorder %v662_v47, 0.0 }
 0x188   : > { %v1499_v46 = vpop.eup %1498  ;;  %1516 = vrcp.f32 %v1006_v38  ;;  %v899_v18 = vsub.f32 0.0, %v674_v5  ;;  %v915_v26 = vsub.f32 0.0, %v754_v7 }
 0x189   : > { %v1501_v31 = vpop.eup %1500  ;;  %v1052_v48 = vmul.f32 %v1499_v46, %v860_v11  ;;  %1518 = vpow2.f32 %v934_v40  ;;  %v2038_v51 = vpop.f32.mrb[16].mxu0  ;;  %v831_v11 = vmul.f32 0.01, %v2029_v39  ;;  %v832_v46 = vmul.f32 0.01, %v658_v17 }
 0x18a   : > { %v2040_v32 = vpop.f32.mrb[16].mxu1  ;;  %v1503_v52 = vpop.eup %1502  ;;  %v1068_v53 = vmul.f32 %v1501_v31, %v876_v20  ;;  %1520 = vpow2.f32 %v966_v25  ;;  %v847_v20 = vmul.f32 0.01, %v2033_v41  ;;  %v938_v30 = vmul.f32 1.442695, %v899_v18 }
 0x18b   : > { %v679_v57 = vpop.f32.mrb[17].mxu0  ;;  %v2044_v58 = vpop.f32.mrb[17].mxu1  ;;  %1084 = vst [vmem:[%s2048_s8] sm:$0xff] %v1052_v48  ;;  %v991_v61 = vadd.f32 1.0, %v1503_v52  ;;  %v970_v34 = vmul.f32 1.442695, %v915_v26  ;;  %v863_v27 = vsel %vm799_vm6, %v2029_v39, %v831_v11  ;;  %v742_v39 = vadd.f32 %v1999_v55, %v1985_v36 }
 0x18c   : > { %v1505_v59 = vpop.eup %1504  ;;  %v2054_v0 = vpop.f32.mrb[18].mxu0  ;;  %1100 = vst [vmem:[%s2048_s8 + $0x80] sm:$0xff] %v1068_v53  ;;  %v879_v54 = vsel %vm815_vm7, %v2033_v41, %v847_v20  ;;  %v833_v41 = vmul.f32 0.01, %v662_v47 }
 0x18d   : > { %v1507_v1 = vpop.eup %1506  ;;  %v1053_v2 = vmul.f32 %v1505_v59, %v861_v35  ;;  %v2060_v8 = vpop.f32.mrb[18].mxu1  ;;  %1522 = vrcp.f32 %v991_v61  ;;  %v680_v35 = vadd.f32 %v679_v57, %v1967_v4  ;;  %v760_v59 = vadd.f32 %v2044_v58, %v1967_v4 }
 0x18e   : > { %v683_v9 = vpop.f32.mrb[19].mxu0  ;;  %v1509_v6 = vpop.eup %1508  ;;  %v1069_v10 = vmul.f32 %v1507_v1, %v877_v60  ;;  %1524 = vpow2.f32 %v936_v62  ;;  %v848_v60 = vmul.f32 0.01, %v738_v44  ;;  %v849_v5 = vmul.f32 0.01, %v742_v39 }
 0x18f   : > { %v2064_v13 = vpop.f32.mrb[19].mxu1  ;;  %v1511_v14 = vpop.eup %1510  ;;  %1085 = vst [vmem:[%s2048_s8 + $0x8] sm:$0xff] %v1053_v2  ;;  %v1007_v12 = vadd.f32 1.0, %v1509_v6  ;;  %1526 = vpow2.f32 %v968_v63  ;;  %v900_v52 = vsub.f32 0.0, %v680_v35  ;;  %v684_v61 = vadd.f32 %v683_v9, %v1967_v4 }
 0x190   : > { %v1513_v19 = vpop.eup %1512  ;;  %1101 = vst [vmem:[%s2048_s8 + $0x88] sm:$0xff] %v1069_v10  ;;  %v992_v21 = vadd.f32 1.0, %v1511_v14  ;;  %v864_v63 = vsel %vm800_vm8, %v658_v17, %v832_v46  ;;  %v916_v1 = vsub.f32 0.0, %v760_v59  ;;  %v2111_v58 = vadd.f32 %v2007_v15, %v1985_v36 }
 0x191   : > { %1528 = vrcp.f32 %v1007_v12  ;;  %v1008_v29 = vadd.f32 1.0, %v1513_v19  ;;  %v1515_v33 = vpop.eup %1514  ;;  %v2077_v24 = vpop.f32.mrb[20].mxu0  ;;  %v940_v55 = vmul.f32 1.442695, %v900_v52  ;;  %v901_v9 = vsub.f32 0.0, %v684_v61 }
 0x192   : > { %1530 = vrcp.f32 %v992_v21  ;;  %v2079_v37 = vpop.f32.mrb[20].mxu1  ;;  %v1517_v38 = vpop.eup %1516  ;;  %v1054_v40 = vmul.f32 %v1515_v33, %v862_v3  ;;  %v972_v10 = vmul.f32 1.442695, %v916_v1  ;;  %v880_v17 = vsel %vm816_vm9, %v738_v44, %v848_v60 }
 0x193   : > { %1532 = vrcp.f32 %v1008_v29  ;;  %v2084_v25 = vpop.f32.mrb[21].mxu0  ;;  %v2086_v45 = vpop.f32.mrb[21].mxu1  ;;  %v1070_v43 = vmul.f32 %v1517_v38, %v878_v28  ;;  %vm817_vm11 = vcmp.ge.f32.partialorder %v742_v39, 0.0  ;;  %v764_v19 = vadd.f32 %v2064_v13, %v1967_v4 }
 0x194   : > { %v1519_v42 = vpop.eup %1518  ;;  %1534 = vpow2.f32 %v938_v30  ;;  %v2090_v31 = vpop.f32.mrb[22].mxu0  ;;  %1086 = vst [vmem:[%s2048_s8 + $0x10] sm:$0xff] %v1054_v40  ;;  %v748_v28 = vadd.f32 %v2009_v16, %v1985_v36  ;;  %v942_v29 = vmul.f32 1.442695, %v901_v9  ;;  %v865_v13 = vsel %vm801_vm10, %v662_v47, %v833_v41 }
 0x195   : > { %v2092_v48 = vpop.f32.mrb[22].mxu1  ;;  %v1521_v49 = vpop.eup %1520  ;;  %v993_v50 = vadd.f32 1.0, %v1519_v42  ;;  %1536 = vpow2.f32 %v970_v34  ;;  %1102 = vst [vmem:[%s2048_s8 + $0x90] sm:$0xff] %v1070_v43  ;;  %v917_v35 = vsub.f32 0.0, %v764_v19  ;;  %v881_v42 = vsel %vm817_vm11, %v742_v39, %v849_v5 }
 0x196   : > { %v2097_v53 = vpop.f32.mrb[23].mxu0  ;;  %v2099_v56 = vpop.f32.mrb[23].mxu1  ;;  %v1009_v57 = vadd.f32 1.0, %v1521_v49  ;;  %vm802_vm12 = vcmp.ge.f32.partialorder %v2111_v58, 0.0  ;;  %v834_v46 = vmul.f32 0.01, %v2111_v58  ;;  %v690_v52 = vadd.f32 %v2084_v25, %v1967_v4 }
 0x197   : > { %1538 = vrcp.f32 %v993_v50  ;;  %v1523_v62 = vpop.eup %1522  ;;  %v974_v49 = vmul.f32 1.442695, %v917_v35  ;;  %vm818_vm13 = vcmp.ge.f32.partialorder %v748_v28, 0.0  ;;  %v672_v59 = vadd.f32 %v2017_v22, %v1985_v36 }
 0x198   : > { %1540 = vrcp.f32 %v1009_v57  ;;  %v1525_v2 = vpop.eup %1524  ;;  %v1055_v3 = vmul.f32 %v1523_v62, %v863_v27  ;;  %v850_v57 = vmul.f32 0.01, %v748_v28  ;;  %v752_v60 = vadd.f32 %v2019_v23, %v1985_v36 }
 0x199   : > { %1542 = vpow2.f32 %v940_v55  ;;  %v1527_v7 = vpop.eup %1526  ;;  %v994_v6 = vadd.f32 1.0, %v1525_v2  ;;  %v2113_v11 = vpop.f32.mrb[24].mxu0  ;;  %v902_v62 = vsub.f32 0.0, %v690_v52  ;;  %v866_v23 = vsel %vm802_vm12, %v2111_v58, %v834_v46 }
 0x19a   : > { %v2115_v14 = vpop.f32.mrb[24].mxu1  ;;  %1087 = vst [vmem:[%s2048_s8 + $0x18] sm:$0xff] %v1055_v3  ;;  %v1010_v18 = vadd.f32 1.0, %v1527_v7  ;;  %v2121_v20 = vpop.f32.mrb[25].mxu0  ;;  %vm803_vm14 = vcmp.ge.f32.partialorder %v672_v59, 0.0  ;;  %v774_v9 = vadd.f32 %v2099_v56, %v1967_v4  ;;  %vm819_vm15 = vcmp.ge.f32.partialorder %v752_v60, 0.0 }
 0x19b   : > { %v1529_v12 = vpop.eup %1528  ;;  %v2123_v15 = vpop.f32.mrb[25].mxu1  ;;  %1544 = vrcp.f32 %v994_v6  ;;  %v944_v5 = vmul.f32 1.442695, %v902_v62  ;;  %v882_v6 = vsel %vm818_vm13, %v748_v28, %v850_v57  ;;  %v835_v19 = vmul.f32 0.01, %v672_v59 }
 0x19c   : > { %v1531_v21 = vpop.eup %1530  ;;  %v1071_v26 = vmul.f32 %v1529_v12, %v879_v54  ;;  %v2127_v30 = vpop.f32.mrb[26].mxu0  ;;  %1546 = vrcp.f32 %v1010_v18  ;;  %v770_v54 = vadd.f32 %v2086_v45, %v1967_v4  ;;  %v700_v58 = vadd.f32 %v2121_v20, %v1967_v4 }
 0x19d   : > { %v2129_v33 = vpop.f32.mrb[26].mxu1  ;;  %v1533_v44 = vpop.eup %1532  ;;  %v1056_v34 = vmul.f32 %v1531_v21, %v864_v63  ;;  %1548 = vpow2.f32 %v972_v10  ;;  %v694_v10 = vadd.f32 %v2097_v53, %v1967_v4  ;;  %v851_v56 = vmul.f32 0.01, %v752_v60 }
 0x19e   : > { %v2132_v38 = vpop.f32.mrb[27].mxu0  ;;  %v2134_v40 = vpop.f32.mrb[27].mxu1  ;;  %1103 = vst [vmem:[%s2048_s8 + $0x98] sm:$0xff] %v1071_v26  ;;  %v1072_v16 = vmul.f32 %v1533_v44, %v880_v17  ;;  %1550 = vpow2.f32 %v942_v29  ;;  %v918_v63 = vsub.f32 0.0, %v770_v54  ;;  %v919_v35 = vsub.f32 0.0, %v774_v9 }
 0x19f   : > { %v1535_v27 = vpop.eup %1534  ;;  %1088 = vst [vmem:[%s2048_s8 + $0x20] sm:$0xff] %v1056_v34  ;;  %v903_v29 = vsub.f32 0.0, %v694_v10  ;;  %v883_v52 = vsel %vm819_vm15, %v752_v60, %v851_v56  ;;  %v688_v56 = vadd.f32 %v2077_v24, %v1985_v36 }
 0x1a0   : > { %v1537_v43 = vpop.eup %1536  ;;  %v995_v47 = vadd.f32 1.0, %v1535_v27  ;;  %1104 = vst [vmem:[%s2048_s8 + $0xa0] sm:$0xff] %v1072_v16  ;;  %v976_v7 = vmul.f32 1.442695, %v918_v63  ;;  %v978_v46 = vmul.f32 1.442695, %v919_v35  ;;  %v704_v63 = vadd.f32 %v2132_v38, %v1967_v4 }
 0x1a1   : > { %v1011_v50 = vadd.f32 1.0, %v1537_v43  ;;  %v1539_v39 = vpop.eup %1538  ;;  %v2150_v25 = vpop.f32.mrb[28].mxu0  ;;  %v946_v16 = vmul.f32 1.442695, %v903_v29  ;;  %vm806_vm4 = vcmp.ge.f32.partialorder %v688_v56, 0.0 }
 0x1a2   : > { %1552 = vrcp.f32 %v995_v47  ;;  %v1541_v55 = vpop.eup %1540  ;;  %v1057_v61 = vmul.f32 %v1539_v39, %v865_v13  ;;  %v2152_v1 = vpop.f32.mrb[28].mxu1  ;;  %v678_v13 = vadd.f32 %v2038_v51, %v1985_v36  ;;  %v904_v47 = vsub.f32 0.0, %v700_v58 }
 0x1a3   : > { %1554 = vrcp.f32 %v1011_v50  ;;  %v1543_v45 = vpop.eup %1542  ;;  %v1073_v2 = vmul.f32 %v1541_v55, %v881_v42  ;;  %v2154_v3 = vpop.f32.mrb[29].mxu0  ;;  %v758_v42 = vadd.f32 %v2040_v32, %v1985_v36  ;;  %v867_v50 = vsel %vm803_vm14, %v672_v59, %v835_v19 }
 0x1a4   : > { %1556 = vpow2.f32 %v974_v49  ;;  %v2156_v22 = vpop.f32.mrb[29].mxu1  ;;  %1089 = vst [vmem:[%s2048_s8 + $0x28] sm:$0xff] %v1057_v61  ;;  %v996_v41 = vadd.f32 1.0, %v1543_v45  ;;  %v2168_v12 = vpop.f32.mrb[30].mxu0  ;;  %v780_v51 = vadd.f32 %v2123_v15, %v1967_v4  ;;  %v836_v57 = vmul.f32 0.01, %v678_v13 }
 0x1a5   : > { %1105 = vst [vmem:[%s2048_s8 + $0xa8] sm:$0xff] %v1073_v2  ;;  %v2170_v17 = vpop.f32.mrb[30].mxu1  ;;  %v1545_v18 = vpop.eup %1544  ;;  %v948_v55 = vmul.f32 1.442695, %v904_v47  ;;  %vm804_vm0 = vcmp.ge.f32.partialorder %v678_v13, 0.0  ;;  %vm820_vm1 = vcmp.ge.f32.partialorder %v758_v42, 0.0  ;;  %v682_v59 = vadd.f32 %v2054_v0, %v1985_v36 }
 0x1a6   : > { %1558 = vrcp.f32 %v996_v41  ;;  %v2174_v21 = vpop.f32.mrb[31].mxu0  ;;  %v2176_v26 = vpop.f32.mrb[31].mxu1  ;;  %v1058_v28 = vmul.f32 %v1545_v18, %v866_v23  ;;  %v920_v62 = vsub.f32 0.0, %v780_v51  ;;  %v784_v45 = vadd.f32 %v2134_v40, %v1967_v4 }
 0x1a7   : > { %v1547_v53 = vpop.eup %1546  ;;  %1560 = vpow2.f32 %v944_v5  ;;  %v868_v23 = vsel %vm804_vm0, %v678_v13, %v836_v57  ;;  %v852_v41 = vmul.f32 0.01, %v758_v42  ;;  %v762_v5 = vadd.f32 %v2060_v8, %v1985_v36 }
 0x1a8   : > { %v1549_v44 = vpop.eup %1548  ;;  %v1074_v34 = vmul.f32 %v1547_v53, %v882_v6  ;;  %1562 = vpow2.f32 %v976_v7  ;;  %1090 = vst [vmem:[%s2048_s8 + $0x30] sm:$0xff] %v1058_v28  ;;  %v980_v15 = vmul.f32 1.442695, %v920_v62  ;;  %v905_v6 = vsub.f32 0.0, %v704_v63 }
 0x1a9   : > { %v1551_v27 = vpop.eup %1550  ;;  %v1012_v20 = vadd.f32 1.0, %v1549_v44  ;;  %v921_v10 = vsub.f32 0.0, %v784_v45  ;;  %vm805_vm2 = vcmp.ge.f32.partialorder %v682_v59, 0.0  ;;  %v837_v18 = vmul.f32 0.01, %v682_v59 }
 0x1aa   : > { %1106 = vst [vmem:[%s2048_s8 + $0xb0] sm:$0xff] %v1074_v34  ;;  %v997_v43 = vadd.f32 1.0, %v1551_v27  ;;  %v950_v58 = vmul.f32 1.442695, %v905_v6  ;;  %v710_v53 = vadd.f32 %v2154_v3, %v1967_v4  ;;  %v884_v28 = vsel %vm820_vm1, %v758_v42, %v852_v41 }
 0x1ab   : > { %1564 = vrcp.f32 %v1012_v20  ;;  %v982_v40 = vmul.f32 1.442695, %v921_v10  ;;  %v853_v8 = vmul.f32 0.01, %v762_v5  ;;  %vm821_vm3 = vcmp.ge.f32.partialorder %v762_v5, 0.0 }
 0x1ac   : > { %v1553_v49 = vpop.eup %1552  ;;  %1566 = vrcp.f32 %v997_v43  ;;  %v906_v44 = vsub.f32 0.0, %v710_v53  ;;  %v790_v34 = vadd.f32 %v2156_v22, %v1967_v4  ;;  %v869_v3 = vsel %vm805_vm2, %v682_v59, %v837_v18 }
 0x1ad   : > { %v1555_v54 = vpop.eup %1554  ;;  %v1059_v39 = vmul.f32 %v1553_v49, %v867_v50  ;;  %1568 = vpow2.f32 %v946_v16  ;;  %v768_v27 = vadd.f32 %v2079_v37, %v1985_v36  ;;  %v885_v43 = vsel %vm821_vm3, %v762_v5, %v853_v8 }
 0x1ae   : > { %v1557_v32 = vpop.eup %1556  ;;  %v1075_v61 = vmul.f32 %v1555_v54, %v883_v52  ;;  %1570 = vpow2.f32 %v978_v46  ;;  %v952_v16 = vmul.f32 1.442695, %v906_v44  ;;  %v922_v47 = vsub.f32 0.0, %v790_v34 }
 0x1af   : > { %1091 = vst [vmem:[%s2048_s8 + $0x38] sm:$0xff] %v1059_v39  ;;  %v1013_v60 = vadd.f32 1.0, %v1557_v32  ;;  %1572 = vpow2.f32 %v948_v55  ;;  %v838_v49 = vmul.f32 0.01, %v688_v56  ;;  %v714_v37 = vadd.f32 %v2174_v21, %v1967_v4 }
 0x1b0   : > { %1107 = vst [vmem:[%s2048_s8 + $0xb8] sm:$0xff] %v1075_v61  ;;  %v1559_v2 = vpop.eup %1558  ;;  %vm822_vm5 = vcmp.ge.f32.partialorder %v768_v27, 0.0  ;;  %v984_v54 = vmul.f32 1.442695, %v922_v47  ;;  %v854_v55 = vmul.f32 0.01, %v768_v27  ;;  %v692_v32 = vadd.f32 %v2090_v31, %v1985_v36 }
 0x1b1   : > { %1574 = vrcp.f32 %v1013_v60  ;;  %v1561_v0 = vpop.eup %1560  ;;  %v1060_v7 = vmul.f32 %v1559_v2, %v868_v23  ;;  %v907_v62 = vsub.f32 0.0, %v714_v37  ;;  %v794_v59 = vadd.f32 %v2176_v26, %v1967_v4 }
 0x1b2   : > { %1576 = vpow2.f32 %v980_v15  ;;  %v1563_v9 = vpop.eup %1562  ;;  %v998_v38 = vadd.f32 1.0, %v1561_v0  ;;  %v870_v21 = vsel %vm806_vm4, %v688_v56, %v838_v49  ;;  %v772_v60 = vadd.f32 %v2092_v48, %v1985_v36 }
 0x1b3   : > { %1092 = vst [vmem:[%s2048_s8 + $0x40] sm:$0xff] %v1060_v7  ;;  %v1014_v19 = vadd.f32 1.0, %v1563_v9  ;;  %v698_v63 = vadd.f32 %v2113_v11, %v1985_v36  ;;  %v954_v31 = vmul.f32 1.442695, %v907_v62  ;;  %v923_v45 = vsub.f32 0.0, %v794_v59 }
 0x1b4   : > { %1578 = vrcp.f32 %v998_v38  ;;  %v886_v23 = vsel %vm822_vm5, %v768_v27, %v854_v55  ;;  %v839_v26 = vmul.f32 0.01, %v692_v32  ;;  %v778_v48 = vadd.f32 %v2115_v14, %v1985_v36 }
 0x1b5   : > { %v1565_v29 = vpop.eup %1564  ;;  %1580 = vrcp.f32 %v1014_v19  ;;  %v986_v0 = vmul.f32 1.442695, %v923_v45  ;;  %vm807_vm6 = vcmp.ge.f32.partialorder %v692_v32, 0.0  ;;  %v855_v11 = vmul.f32 0.01, %v772_v60 }
 0x1b6   : > { %v1567_v13 = vpop.eup %1566  ;;  %v1076_v35 = vmul.f32 %v1565_v29, %v884_v28  ;;  %1582 = vpow2.f32 %v950_v58  ;;  %vm823_vm7 = vcmp.ge.f32.partialorder %v772_v60, 0.0  ;;  %v840_v10 = vmul.f32 0.01, %v698_v63 }
 0x1b7   : > { %v1569_v20 = vpop.eup %1568  ;;  %v1061_v24 = vmul.f32 %v1567_v13, %v869_v3  ;;  %1584 = vpow2.f32 %v982_v40  ;;  %vm808_vm8 = vcmp.ge.f32.partialorder %v698_v63, 0.0  ;;  %v871_v19 = vsel %vm807_vm6, %v692_v32, %v839_v26 }
 0x1b8   : > { %v1571_v42 = vpop.eup %1570  ;;  %1108 = vst [vmem:[%s2048_s8 + $0xc0] sm:$0xff] %v1076_v35  ;;  %v999_v46 = vadd.f32 1.0, %v1569_v20  ;;  %1586 = vpow2.f32 %v952_v16  ;;  %v856_v58 = vmul.f32 0.01, %v778_v48  ;;  %v887_v53 = vsel %vm823_vm7, %v772_v60, %v855_v11 }
 0x1b9   : > { %v1573_v22 = vpop.eup %1572  ;;  %1093 = vst [vmem:[%s2048_s8 + $0x48] sm:$0xff] %v1061_v24  ;;  %v1015_v50 = vadd.f32 1.0, %v1571_v42  ;;  %vm824_vm9 = vcmp.ge.f32.partialorder %v778_v48, 0.0  ;;  %v702_v8 = vadd.f32 %v2127_v30, %v1985_v36  ;;  %v872_v44 = vsel %vm808_vm8, %v698_v63, %v840_v10 }
 0x1ba   : > { %1588 = vrcp.f32 %v999_v46  ;;  %v1000_v51 = vadd.f32 1.0, %v1573_v22  ;;  %v782_v34 = vadd.f32 %v2129_v33, %v1985_v36  ;;  %v888_v27 = vsel %vm824_vm9, %v778_v48, %v856_v58 }
 0x1bb   : > { %v1575_v52 = vpop.eup %1574  ;;  %1590 = vrcp.f32 %v1015_v50  ;;  %v708_v20 = vadd.f32 %v2150_v25, %v1985_v36  ;;  %v841_v16 = vmul.f32 0.01, %v702_v8  ;;  %vm809_vm10 = vcmp.ge.f32.partialorder %v702_v8, 0.0 }
 0x1bc   : > { %v1577_v39 = vpop.eup %1576  ;;  %v1077_v57 = vmul.f32 %v1575_v52, %v885_v43  ;;  %1592 = vrcp.f32 %v1000_v51  ;;  %v857_v43 = vmul.f32 0.01, %v782_v34  ;;  %vm825_vm11 = vcmp.ge.f32.partialorder %v782_v34, 0.0 }
 0x1bd   : > { %v1016_v61 = vadd.f32 1.0, %v1577_v39  ;;  %1594 = vpow2.f32 %v984_v54  ;;  %v842_v47 = vmul.f32 0.01, %v708_v20  ;;  %v788_v22 = vadd.f32 %v2152_v1, %v1985_v36 }
 0x1be   : > { %1109 = vst [vmem:[%s2048_s8 + $0xc8] sm:$0xff] %v1077_v57  ;;  %v1579_v15 = vpop.eup %1578  ;;  %v873_v25 = vsel %vm809_vm10, %v702_v8, %v841_v16  ;;  %vm810_vm12 = vcmp.ge.f32.partialorder %v708_v20, 0.0  ;;  %v889_v52 = vsel %vm825_vm11, %v782_v34, %v857_v43  ;;  %v712_v39 = vadd.f32 %v2168_v12, %v1985_v36 }
 0x1bf   : > { %1596 = vrcp.f32 %v1016_v61  ;;  %v1581_v2 = vpop.eup %1580  ;;  %v1062_v4 = vmul.f32 %v1579_v15, %v870_v21  ;;  %v874_v1 = vsel %vm810_vm12, %v708_v20, %v842_v47  ;;  %v858_v55 = vmul.f32 0.01, %v788_v22 }
 0x1c0   : > { %v1583_v41 = vpop.eup %1582  ;;  %v1078_v5 = vmul.f32 %v1581_v2, %v886_v23  ;;  %1598 = vpow2.f32 %v954_v31  ;;  %vm826_vm13 = vcmp.ge.f32.partialorder %v788_v22, 0.0  ;;  %v792_v61 = vadd.f32 %v2170_v17, %v1985_v36 }
 0x1c1   : > { %v1585_v7 = vpop.eup %1584  ;;  %1094 = vst [vmem:[%s2048_s8 + $0x50] sm:$0xff] %v1062_v4  ;;  %v1001_v6 = vadd.f32 1.0, %v1583_v41  ;;  %1600 = vpow2.f32 %v986_v0  ;;  %v843_v62 = vmul.f32 0.01, %v712_v39  ;;  %v890_v21 = vsel %vm826_vm13, %v788_v22, %v858_v55 }
 0x1c2   : > { %1110 = vst [vmem:[%s2048_s8 + $0xd0] sm:$0xff] %v1078_v5  ;;  %v1017_v9 = vadd.f32 1.0, %v1585_v7  ;;  %v1587_v18 = vpop.eup %1586  ;;  %vm811_vm14 = vcmp.ge.f32.partialorder %v712_v39, 0.0  ;;  %v859_v60 = vmul.f32 0.01, %v792_v61  ;;  %vm827_vm15 = vcmp.ge.f32.partialorder %v792_v61, 0.0 }
 0x1c3   : > { %1602 = vrcp.f32 %v1001_v6  ;;  %v1002_v14 = vadd.f32 1.0, %v1587_v18  ;;  %v875_v63 = vsel %vm811_vm14, %v712_v39, %v843_v62 }
 0x1c4   : > { %v1589_v38 = vpop.eup %1588  ;;  %1604 = vrcp.f32 %v1017_v9  ;;  %v891_v36 = vsel %vm827_vm15, %v792_v61, %v859_v60 }
 0x1c5   : > { %v1591_v40 = vpop.eup %1590  ;;  %v1063_v28 = vmul.f32 %v1589_v38, %v871_v19  ;;  %1606 = vrcp.f32 %v1002_v14 }
 0x1c6   : > { %v1593_v56 = vpop.eup %1592  ;;  %v1079_v29 = vmul.f32 %v1591_v40, %v887_v53 }
 0x1c7   : > { %v1595_v13 = vpop.eup %1594  ;;  %1095 = vst [vmem:[%s2048_s8 + $0x58] sm:$0xff] %v1063_v28  ;;  %v1064_v35 = vmul.f32 %v1593_v56, %v872_v44 }
 0x1c8   : > { %1111 = vst [vmem:[%s2048_s8 + $0xd8] sm:$0xff] %v1079_v29  ;;  %v1018_v24 = vadd.f32 1.0, %v1595_v13 }
 0x1c9   : > { %v1597_v3 = vpop.eup %1596  ;;  %1096 = vst [vmem:[%s2048_s8 + $0x60] sm:$0xff] %v1064_v35 }
 0x1ca   : > { %v1080_v30 = vmul.f32 %v1597_v3, %v888_v27  ;;  %v1599_v42 = vpop.eup %1598  ;;  %1608 = vrcp.f32 %v1018_v24 }
 0x1cb   : > { %v1003_v33 = vadd.f32 1.0, %v1599_v42  ;;  %v1601_v46 = vpop.eup %1600 }
 0x1cc   : > { %1112 = vst [vmem:[%s2048_s8 + $0xe0] sm:$0xff] %v1080_v30  ;;  %v1019_v50 = vadd.f32 1.0, %v1601_v46 }
 0x1cd   : > { %v1603_v49 = vpop.eup %1602  ;;  %1610 = vrcp.f32 %v1003_v33 }
 0x1ce   : > { %v1605_v37 = vpop.eup %1604  ;;  %v1065_v51 = vmul.f32 %v1603_v49, %v873_v25  ;;  %1612 = vrcp.f32 %v1019_v50 }
 0x1cf   : > { %v1081_v54 = vmul.f32 %v1605_v37, %v889_v52  ;;  %v1607_v57 = vpop.eup %1606 }
 0x1d0   : > { %1097 = vst [vmem:[%s2048_s8 + $0x68] sm:$0xff] %v1065_v51  ;;  %v1066_v32 = vmul.f32 %v1607_v57, %v874_v1 }
 0x1d1   : > { %1113 = vst [vmem:[%s2048_s8 + $0xe8] sm:$0xff] %v1081_v54 }
 0x1d2   : > { %1098 = vst [vmem:[%s2048_s8 + $0x70] sm:$0xff] %v1066_v32 }
 0x1d4   : > { %v1609_v59 = vpop.eup %1608 }
 0x1d5   : > { %v1082_v12 = vmul.f32 %v1609_v59, %v890_v21 }
 0x1d7   : > { %v1611_v15 = vpop.eup %1610  ;;  %1114 = vst [vmem:[%s2048_s8 + $0xf0] sm:$0xff] %v1082_v12 }
 0x1d8   : > { %v1067_v31 = vmul.f32 %v1611_v15, %v875_v63  ;;  %v1613_v45 = vpop.eup %1612 }
 0x1d9   : > { %v1083_v17 = vmul.f32 %v1613_v45, %v891_v36 }
 0x1da   : > { %1099 = vst [vmem:[%s2048_s8 + $0x78] sm:$0xff] %v1067_v31 }
 0x1db   : > { %1115 = vst [vmem:[%s2048_s8 + $0xf8] sm:$0xff] %v1083_v17 }
 0x1dc   : > { %1685 = shalt.err (!%p1682_p7)
}
 0x1dd   : > { %s1686_s30 = scalar_lea.hbm %s2253_s11, 4096  ;;  %s1690_s10 = scalar_lea.hbm %s2304_s3, 8192 }
 0x1de   : > { %p1687_p9 = scmp.ne.s32.totalorder %s2253_s11, %s1686_s30  ;;  %p1691_p5 = scmp.lt.u32.totalorder %s2253_s11, %s2304_s3 }
 0x1df   : > { %p1692_p11 = scmp.lt.u32.totalorder %s1690_s10, %s1686_s30  ;;  %p1694_p4 = scmp.lt.u32.totalorder %s1686_s30, %s2253_s11 }
 0x1e0   : > { %p1688_p1 = pnand %p1687_p9, %p1865_p12 }
 0x1e1   : > { %p1693_p2 = por %p1692_p11, %p1691_p5 }
 0x1e2   : > { %p1689_p0 = pneg %p1688_p1 }
 0x1e3   : > { %p1695_p6 = por %p1694_p4, %p1693_p2 }
 0x1e5   : > { %p1696_p8 = pnand %p1695_p6, %p1689_p0 }
 0x1e7   : > { %1699 = shalt.err (!%p1696_p8)
}
 0x1e8   : > { %s1749_s20 = smov 128   ;;  %s1750_s8 = smov 8  }
 0x1e9   : > { %1335 = dma.vmem_to_hbm [thread:$0]  (%p1865_p12), %s2255_s4, 4096, %s2253_s11, %s1117_s16, %s1749_s20, %s1749_s20, %s1750_s8  }
 0x1ea PF: > { %s1145_s9 = sand.u32 1, %s1730_s12   ;;  %p2319_p10 = scmp.ne.s32.totalorder %s2309_s19, 0 }
 0x1eb   : > { %p2320_p13 = scmp.ge.s32.totalorder %s1742_s15, 2  ;;  %s1146_s25 = scalar_lea.sflag [#allocation4], %s1145_s9 }
 0x1ed   : > { %p1346_p3 = pnand %p2320_p13, %p2319_p10 }
 0x1ef   : > { %1725 = dma.done.wait (!%p1346_p3), %s1146_s25, 4096  }
 0x1f0   : > { %1727 = vsyncadd (!%p1346_p3), %s1146_s25, 4294963200  ;;  %p17_p7 = scmp.ge.s32.totalorder %s1827_s24, 4   ;;  %s2321_s12 = smov %s1734_s13 }
 0x1f1   : > { %s2322_s13 = smov %s1738_s14  ;;  %s2323_s14 = smov %s1861_s17 }
 0x1f2   : > { %s2324_s15 = smov %s1827_s24  ;;  %19 = sbr.rel (!%p17_p7) target bundleno = 6 (0x6), region = 81 }
 0x1f9   :  { %1151 = vsyncpa [#allocation3], 1 }
 0x1fa   :  { %1153 = vsyncpa [#allocation3 + $0x1], 1 }
 0x1fb   :  { %1154 = vsyncpa [#allocation6], 1 }
 0x1fc   :  { %1155 = vsyncpa [#allocation4], 1 }
 0x1fd   :  { %1157 = vsyncpa [#allocation4 + $0x1], 1 }

</bundles_post_ra>
